<compile_context>
chip_gen: v7x
topology: tpu7x:2x2x1
jax: 0.10.0
libtpu: 0.0.40
codegen_flags: <defaults>
</compile_context>

<pallas_src>
import jax
import jax.numpy as jnp
from jax.experimental import pallas as pl
from jax.experimental.pallas import tpu as pltpu


def _head_kernel(x_ref, w_ref, b_ref, o_ref, acc_ref):
    """One (batch-tile, channel-tile) step of the fused avgpool+linear head.

    x_ref  : [tn, tc, HW]   activation slice of [N, C, HW]
    w_ref  : [tc, OUT_pad]  FC weight slice, pre-scaled by 1/HW (f32)
    b_ref  : [1, OUT_pad]   bias, zero-padded to lane width (f32)
    o_ref  : [tn, OUT_pad]  output tile
    acc_ref: [tn, OUT_pad]  f32 accumulator, resident across the channel axis
    """
    c = pl.program_id(1)

    @pl.when(c == 0)
    def _init():
        # Fold the bias into the accumulator init: one broadcast per batch
        # tile instead of an add on every channel step.
        acc_ref[...] = jnp.broadcast_to(b_ref[...], acc_ref.shape)

    # Spatial pooling: sum over HW (the lane axis).  VPU/XLU work, fully
    # hidden under the HBM-bound stream of x.
    pooled = jnp.sum(x_ref[...].astype(jnp.float32), axis=-1)      # [tn, tc]

    # Small MXU contraction over this channel tile; weight carries the 1/HW
    # factor, so the sum above becomes the spatial mean.
    acc_ref[...] += jnp.dot(pooled, w_ref[...],
                            preferred_element_type=jnp.float32)

    @pl.when(c == pl.num_programs(1) - 1)
    def _store():
        # Single lane-dense store per batch tile.
        o_ref[...] = acc_ref[...].astype(o_ref.dtype)


def _pick_tile(dim, align, preferred):
    """Largest multiple of `align` dividing `dim`, capped near `preferred`.
    Falls back to the full dim when it is not a multiple of `align`
    (Pallas allows block == full array dim)."""
    if dim % align != 0:
        return dim
    t = min(preferred, dim)
    t -= t % align
    while t > align and dim % t != 0:
        t -= align
    return max(t, align)


def kinematic_avg_pool_head(x_nchw, fc_weight, fc_bias, *, block_n=256):
    """Forward pass of KinematicAvgPoolHead.

    x_nchw   : [N, C, H, W]
    fc_weight: [OUT, C]   (PyTorch nn.Linear layout)
    fc_bias  : [OUT]
    """
    N, C, H, W = x_nchw.shape
    HW = H * W
    OUT = fc_weight.shape[0]
    OUT_pad = max(128, ((OUT + 127) // 128) * 128)

    # NCHW is contiguous -> this reshape is free (no extra HBM pass).
    x3d = x_nchw.reshape(N, C, HW)

    # Fold the 1/HW of the average pool into the (tiny) FC weight; pad the
    # output dimension to lane width once, outside the kernel.
    w_pad = jnp.pad(fc_weight.T.astype(jnp.float32) / HW,
                    ((0, 0), (0, OUT_pad - OUT)))
    b_pad = jnp.pad(fc_bias.astype(jnp.float32),
                    (0, OUT_pad - OUT)).reshape(1, OUT_pad)

    itemsize = x3d.dtype.itemsize

    # ---- tiling -------------------------------------------------------------
    tn = _pick_tile(N, 8, block_n)           # batch tile
    # Channel tile: keep the double-buffered x tile around <= 8 MiB.
    x_tile_budget = 8 * 1024 * 1024
    tc_cap = max(8, x_tile_budget // max(1, 2 * tn * HW * itemsize))
    tc = _pick_tile(C, 8, tc_cap)            # channel (reduction) tile
    grid = (N // tn, C // tc)

    # ---- VMEM budget: double-buffered inputs + resident accumulator --------
    footprint = (2 * tn * tc * HW * itemsize       # x tiles
                 + 2 * tc * OUT_pad * 4            # weight tiles
                 + 2 * OUT_pad * 4                 # bias
                 + 2 * tn * OUT_pad * itemsize     # output tiles
                 + tn * OUT_pad * 4)               # f32 accumulator scratch
    vmem_limit = int(min(max(32 * 1024 * 1024, 2 * footprint),
                         64 * 1024 * 1024))        # stay within v7x VMEM

    out = pl.pallas_call(
        _head_kernel,
        out_shape=jax.ShapeDtypeStruct((N, OUT_pad), x_nchw.dtype),
        grid_spec=pltpu.PrefetchScalarGridSpec(
            num_scalar_prefetch=0,
            grid=grid,
            in_specs=[
                pl.BlockSpec((tn, tc, HW), lambda i, c: (i, c, 0)),   # x
                pl.BlockSpec((tc, OUT_pad), lambda i, c: (c, 0)),     # weight
                pl.BlockSpec((1, OUT_pad), lambda i, c: (0, 0)),      # bias
            ],
            out_specs=pl.BlockSpec((tn, OUT_pad), lambda i, c: (i, 0)),
            scratch_shapes=[pltpu.VMEM((tn, OUT_pad), jnp.float32)],
        ),
        compiler_params=pltpu.CompilerParams(
            dimension_semantics=("parallel", "arbitrary"),
            vmem_limit_bytes=vmem_limit,
        ),
    )(x3d, w_pad, b_pad)

    # Slice away the lane padding of the output.
    out = out[:, :OUT]

    # TODO(synk): KinematicLayer is not defined in the provided reference
    # module (external forward-kinematics op); left as identity here.
    return out


if __name__ == "__main__":
    # Small shapes consistent with the module: batch=2, in_channels=4,
    # fea_map_size=16 (so H=W=16), out_channels=8.
    N, C, H, W, OUT = 2, 4, 16, 16, 8

    key = jax.random.PRNGKey(0)
    kx, kw, kb = jax.random.split(key, 3)
    x = jax.random.normal(kx, (N, C, H, W), dtype=jnp.float32)
    # Deterministic synthetic parameters (nn.Linear(in_channels, out_channels) shapes).
    fc_weight = jax.random.normal(kw, (OUT, C), dtype=jnp.float32) * 0.1
    fc_bias = jax.random.normal(kb, (OUT,), dtype=jnp.float32) * 0.1

    y = kinematic_avg_pool_head(x, fc_weight, fc_bias)
    y = jax.block_until_ready(y)

    # Reference in plain JAX: AvgPool over the full map + Linear.
    pooled_ref = jnp.mean(x.reshape(N, C, H * W), axis=-1)
    y_ref = pooled_ref @ fc_weight.T + fc_bias
    assert y.shape == (N, OUT)
    assert jnp.allclose(y, y_ref, atol=1e-5, rtol=1e-5)

    print("KERNEL_OK")
</pallas_src>

<mosaic_0001>
module attributes {stable_mosaic.version = 11 : i64} {
  func.func @_head_kernel(%arg0: i32, %arg1: i32, %arg2: memref<2x4x256xf32, #tpu.memory_space<vmem>>, %arg3: memref<4x128xf32, #tpu.memory_space<vmem>>, %arg4: memref<1x128xf32, #tpu.memory_space<vmem>>, %arg5: memref<2x128xf32, #tpu.memory_space<vmem>>, %arg6: memref<2x128xf32, #tpu.memory_space<vmem>>) attributes {dimension_semantics = [#tpu.dimension_semantics<parallel>, #tpu.dimension_semantics<arbitrary>], iteration_bounds = array<i64: 1, 1>, scalar_prefetch = 0 : i64, scratch_operands = 1 : i64, tpu.core_type = #tpu.core_type<tc>, window_params = [{transform_indices = @transform_0, window_bounds = array<i64: 2, 4, 256>}, {transform_indices = @transform_1, window_bounds = array<i64: 4, 128>}, {pipeline_mode = #tpu.pipeline_mode<synchronous>, transform_indices = @transform_2, window_bounds = array<i64: 1, 128>}, {transform_indices = @transform_3, window_bounds = array<i64: 2, 128>}]} {
    %c0_i32 = arith.constant 0 : i32
    %0 = arith.cmpi eq, %arg1, %c0_i32 : i32
    %1 = arith.extui %0 : i1 to i32
    %c0_i32_0 = arith.constant 0 : i32
    %2 = arith.cmpi ne, %1, %c0_i32_0 : i32
    scf.if %2 {
      %c0_12 = arith.constant 0 : index
      %c0_13 = arith.constant 0 : index
      %13 = vector.load %arg4[%c0_12, %c0_13] : memref<1x128xf32, #tpu.memory_space<vmem>>, vector<1x128xf32>
      %14 = vector.shape_cast %13 : vector<1x128xf32> to vector<1x128xf32>
      %15 = vector.broadcast %14 : vector<1x128xf32> to vector<2x128xf32>
      %c0_14 = arith.constant 0 : index
      %c0_15 = arith.constant 0 : index
      %16 = vector.load %arg6[%c0_14, %c0_15] : memref<2x128xf32, #tpu.memory_space<vmem>>, vector<2x128xf32>
      tpu.vector_store %arg6[%c0_14, %c0_15], %15 {strides = array<i32>} : memref<2x128xf32, #tpu.memory_space<vmem>>, vector<2x128xf32>,
    } else {
    }
    %c0 = arith.constant 0 : index
    %c0_1 = arith.constant 0 : index
    %c0_2 = arith.constant 0 : index
    %3 = vector.load %arg2[%c0, %c0_1, %c0_2] : memref<2x4x256xf32, #tpu.memory_space<vmem>>, vector<2x4x256xf32>
    %cst = arith.constant dense<0.000000e+00> : vector<2x4xf32>
    %4 = vector.multi_reduction <add>, %3, %cst [2] : vector<2x4x256xf32> to vector<2x4xf32>
    %c0_3 = arith.constant 0 : index
    %c0_4 = arith.constant 0 : index
    %5 = vector.load %arg6[%c0_3, %c0_4] : memref<2x128xf32, #tpu.memory_space<vmem>>, vector<2x128xf32>
    %c0_5 = arith.constant 0 : index
    %c0_6 = arith.constant 0 : index
    %6 = vector.load %arg3[%c0_5, %c0_6] : memref<4x128xf32, #tpu.memory_space<vmem>>, vector<4x128xf32>
    %cst_7 = arith.constant dense<0.000000e+00> : vector<2x128xf32>
    %7 = tpu.matmul %4, %6, %cst_7 {dimension_numbers = #tpu.dot_dimension_numbers<[1], [0], [0], [1], [0, 0, 1, 1], [], []>} : vector<2x4xf32>, vector<4x128xf32>, vector<2x128xf32> -> vector<2x128xf32>
    %8 = arith.addf %5, %7 : vector<2x128xf32>
    %c0_8 = arith.constant 0 : index
    %c0_9 = arith.constant 0 : index
    %9 = vector.load %arg6[%c0_8, %c0_9] : memref<2x128xf32, #tpu.memory_space<vmem>>, vector<2x128xf32>
    tpu.vector_store %arg6[%c0_8, %c0_9], %8 {strides = array<i32>} : memref<2x128xf32, #tpu.memory_space<vmem>>, vector<2x128xf32>,
    %c0_i32_10 = arith.constant 0 : i32
    %10 = arith.cmpi eq, %arg1, %c0_i32_10 : i32
    %11 = arith.extui %10 : i1 to i32
    %c0_i32_11 = arith.constant 0 : i32
    %12 = arith.cmpi ne, %11, %c0_i32_11 : i32
    scf.if %12 {
      %c0_12 = arith.constant 0 : index
      %c0_13 = arith.constant 0 : index
      %13 = vector.load %arg6[%c0_12, %c0_13] : memref<2x128xf32, #tpu.memory_space<vmem>>, vector<2x128xf32>
      %c0_14 = arith.constant 0 : index
      %c0_15 = arith.constant 0 : index
      %14 = vector.load %arg5[%c0_14, %c0_15] : memref<2x128xf32, #tpu.memory_space<vmem>>, vector<2x128xf32>
      tpu.vector_store %arg5[%c0_14, %c0_15], %13 {strides = array<i32>} : memref<2x128xf32, #tpu.memory_space<vmem>>, vector<2x128xf32>,
    } else {
    }
    return
  }
  func.func @transform_0(%arg0: i32, %arg1: i32) -> (i32, i32, i32) {
    %c0_i32 = arith.constant 0 : i32
    %c0_i32_0 = arith.constant 0 : i32
    return %arg0, %arg1, %c0_i32 : i32, i32, i32
  }
  func.func @transform_1(%arg0: i32, %arg1: i32) -> (i32, i32) {
    %c0_i32 = arith.constant 0 : i32
    %c0_i32_0 = arith.constant 0 : i32
    return %arg1, %c0_i32 : i32, i32
  }
  func.func @transform_2(%arg0: i32, %arg1: i32) -> (i32, i32) {
    %c0_i32 = arith.constant 0 : i32
    %c0_i32_0 = arith.constant 0 : i32
    %c0_i32_1 = arith.constant 0 : i32
    return %c0_i32, %c0_i32_0 : i32, i32
  }
  func.func @transform_3(%arg0: i32, %arg1: i32) -> (i32, i32) {
    %c0_i32 = arith.constant 0 : i32
    %c0_i32_0 = arith.constant 0 : i32
    return %arg0, %c0_i32 : i32, i32
  }
}

</mosaic_0001>

<bundles_post_ra>
// kernel: tpu_custom_call.1
= control target key start
LH: loop header
LB: loop body
LE: loop exit
PB: predicated region body
PF: predicated region fallthrough
CT: control target
= control target key end

     0   :  { %8 = vsyncpa [#allocation4], 0  ;;  %s349_s0 = inlined_call_operand.hbm [shape: f32[2,4,256], index: 0, kind: input, shape index: {}]   ;;  %s350_s1 = inlined_call_operand.hbm [shape: f32[4,128], index: 1, kind: input, shape index: {}]   ;;  %s351_s2 = inlined_call_operand.vmem [shape: f32[1,128], index: 2, kind: input, shape index: {}]   ;;  %s352_s3 = inlined_call_operand.hbm [shape: f32[2,128], index: 3, kind: output, shape index: {}]  }
   0x1   :  { %9 = vsyncpa [#allocation7], 0 }
   0x2   :  { %10 = vsyncpa [#allocation5], 0  ;;  %s278_s12 = smov [#allocation3]   ;;  %s206_s16 = scalar_lea.hbm %s349_s0, 256 }
   0x3   :  { %s16_s13 = sshll.u32 %s278_s12, 4  ;;  %p207_p0 = scmp.ne.s32.totalorder %s349_s0, %s206_s16  ;;  %s17_s13 = int_to_ptr.vmem [resolvable:$true] %s16_s13 }
   0x4   :  { %p210_p1 = scmp.lt.u32.totalorder %s206_s16, %s349_s0 }
   0x6   :  { %p212_p2 = pnand %p210_p1, %p207_p0 }
   0x8   :  { %215 = shalt.err (!%p212_p2)
}
   0x9   :  { %s216_s21 = scalar_lea.vmem %s17_s13, 256  ;;  %p221_p4 = scmp.lt.s32.totalorder %s17_s13, %s17_s13 }
   0xa   :  { %p217_p3 = scmp.ne.s32.totalorder %s17_s13, %s216_s21  ;;  %p222_p5 = scmp.lt.s32.totalorder %s216_s21, %s216_s21 }
   0xc   :  { %p223_p6 = por %p222_p5, %p221_p4 }
   0xe   :  { %p224_p7 = pnand %p223_p6, %p217_p3 }
  0x10   :  { %227 = shalt.err (!%p224_p7)
}
  0x11   :  { %s279_s22 = smov 128   ;;  %s280_s23 = smov 8  }
  0x12   :  { %22 = dma.hbm_to_vmem [thread:$0]  %s349_s0, 256, %s17_s13, [#allocation4], %s279_s22, %s279_s22, %s280_s23  }
  0x13   :  { %s281_s26 = smov [#allocation6]   ;;  %s228_s30 = scalar_lea.hbm %s350_s1, 64 }
  0x14   :  { %s29_s27 = sshll.u32 %s281_s26, 4  ;;  %p229_p8 = scmp.ne.s32.totalorder %s350_s1, %s228_s30  ;;  %s30_s27 = int_to_ptr.vmem [resolvable:$true] %s29_s27 }
  0x15   :  { %p232_p9 = scmp.lt.u32.totalorder %s228_s30, %s350_s1 }
  0x17   :  { %p234_p10 = pnand %p232_p9, %p229_p8 }
  0x19   :  { %237 = shalt.err (!%p234_p10)
}
  0x1a   :  { %s238_s8 = scalar_lea.vmem %s30_s27, 64  ;;  %p243_p12 = scmp.lt.s32.totalorder %s30_s27, %s30_s27 }
  0x1b   :  { %p239_p11 = scmp.ne.s32.totalorder %s30_s27, %s238_s8  ;;  %p244_p13 = scmp.lt.s32.totalorder %s238_s8, %s238_s8 }
  0x1d   :  { %p245_p0 = por %p244_p13, %p243_p12 }
  0x1f   :  { %p246_p1 = pnand %p245_p0, %p239_p11 }
  0x21   :  { %249 = shalt.err (!%p246_p1)
}
  0x22   :  { %32 = dma.hbm_to_vmem [thread:$0]  %s350_s1, 64, %s30_s27, [#allocation7]  }
  0x23   :  { %272 = dma.done.wait [#allocation4], 256  }
  0x24   :  { %273 = vsyncadd [#allocation4], 4294967040 }
  0x25   :  { %274 = dma.done.wait [#allocation7], 64  }
  0x26   :  { %275 = vsyncadd [#allocation7], 4294967232  ;;  %vm61_vm0 = vcmask 1043456   ;;  %v53_v0 = vld [vmem:[#allocation3] sm:$0xff]  ;;  %v54_v1 = vld [vmem:[#allocation3 + $0x8] sm:$0xff]  ;;  %v282_v11 = vmov 0.0   ;;  %v76_v13 = vlaneseq }
  0x27   :  { %v57_v2 = vcombine.high %v53_v0, %v53_v0  ;;  %v62_v3 = vsel %vm61_vm0, %v53_v0, 0.0  ;;  %v58_v4 = vcombine.high %v54_v1, %v54_v1  ;;  %v67_v6 = vsel %vm61_vm0, %v54_v1, 0.0  ;;  %v73_v10 = vld [vmem:[#allocation6] sm:$0xf]  ;;  %192 = vmatprep.subr.mxu0 %v282_v11  ;;  %v187_v12 = vld [vmem:[%s351_s2] ss:$0 sm:$0xff] }
  0x28   :  { %vm283_vm1 = vmmov 0   ;;  %193 = vmatpush3.msk.msra.mxu0 %vm61_vm0, %v73_v10  ;;  %52 = vst [vmem:[#allocation2] sm:$0x3] %v187_v12  ;;  %v77_v14 = vand.u32 127, %v76_v13  ;;  %v79_v15 = vshrl.u32 %v76_v13, 7  ;;  %vm86_vm2 = vcmask 1041409  }
  0x29   :  { %v63_v5 = vsel %vm61_vm0, %v57_v2, 0.0  ;;  %v68_v7 = vsel %vm61_vm0, %v58_v4, 0.0  ;;  %194 = vmatprep.mubr.msk.f32.mxu0 %vm283_vm1, %v282_v11  ;;  %vm88_vm3 = vcmask 31744   ;;  %s284_s11 = smov [#allocation8]  }
  0x2a   :  { %v64_v8 = vadd.f32 %v63_v5, %v62_v3  ;;  %v69_v9 = vadd.f32 %v68_v7, %v67_v6  ;;  %v80_v17 = vsub.s32 %v77_v14, %v79_v15  ;;  %s177_s2 = sshll.u32 %s284_s11, 4  ;;  %s178_s2 = int_to_ptr.vmem [resolvable:$true] %s177_s2 }
  0x2b   :  { %s250_s12 = scalar_lea.vmem %s178_s2, 32  ;;  %p255_p3 = scmp.lt.s32.totalorder %s178_s2, %s178_s2 }
  0x2c   :  { %65 = vadd.xlane.f32.xlu0 %v64_v8  ;;  %p251_p2 = scmp.ne.s32.totalorder %s178_s2, %s250_s12  ;;  %p256_p4 = scmp.lt.s32.totalorder %s250_s12, %s250_s12 }
  0x2e   :  { %p257_p5 = por %p256_p4, %p255_p3 }
  0x2f   :  { %v72_v22 = vld [vmem:[#allocation2] sm:$0x3] }
  0x30   :  { %70 = vadd.xlane.f32.xlu0 %v69_v9  ;;  %p258_p6 = pnand %p257_p5, %p251_p2 }
  0xb9   :  { %v66_v16 = vpop.xlane.xlu0 %65 }
  0xba   :  { %v81_v19 = vrot.slane %v66_v16, %v80_v17 }
  0xbd   :  { %v71_v18 = vpop.xlane.xlu0 %70 }
  0xbe   :  { %v85_v20 = vrot.slane %v71_v18, %v80_v17 }
  0xc0   :  { %v87_v21 = vsel %vm86_vm2, %v85_v20, %v81_v19 }
  0xc1   :  { %195 = vmatmul.mubr.msk.f32.vlgmr.msra.gmra.mrb[0].mxu0 %vm88_vm3, %v87_v21 }
 0x194   :  { %v160_v23 = vpop.f32.mrb[0].mxu0 }
 0x195   :  { %v164_v24 = vadd.f32 %v160_v23, %v72_v22  ;;  %v196_v25 = vpop.f32.mrb[1].mxu0 }
 0x197   :  { %165 = vst [vmem:[#allocation2] sm:$0x3] %v164_v24 }
 0x19e   :  { %v169_v26 = vld [vmem:[#allocation2] sm:$0x3] }
 0x19f   :  { %170 = vst [vmem:[#allocation8] sm:$0x3] %v169_v26 }
 0x1a0   :  { %261 = shalt.err (!%p258_p6)
}
 0x1a1   :  { %s262_s15 = scalar_lea.hbm %s352_s3, 32 }
 0x1a2   :  { %p263_p7 = scmp.ne.s32.totalorder %s352_s3, %s262_s15  ;;  %p266_p8 = scmp.lt.u32.totalorder %s262_s15, %s352_s3 }
 0x1a4   :  { %p268_p9 = pnand %p266_p8, %p263_p7 }
 0x1a6   :  { %271 = shalt.err (!%p268_p9)
}
 0x1a7   :  { %180 = dma.vmem_to_hbm [thread:$0]  %s178_s2, 32, %s352_s3, [#allocation5]  }
 0x1a8   :  { %276 = dma.done.wait [#allocation5], 32  }
 0x1a9   :  { %277 = vsyncadd [#allocation5], 4294967264 }
 0x1aa   :  { %184 = vsyncpa [#allocation4], 1 }
 0x1ab   :  { %185 = vsyncpa [#allocation7], 1 }
 0x1ac   :  { %186 = vsyncpa [#allocation5], 1 }

</bundles_post_ra>
